<compile_context>
chip_gen: v6e
topology: v6e:2x2x1
jax: 0.10.0
libtpu: 0.0.40
codegen_flags: <defaults>
</compile_context>

<pallas_src>
import math
from functools import partial

import jax
import jax.numpy as jnp
from jax.experimental import pallas as pl
from jax.experimental.pallas import tpu as pltpu


def _round_up(a, b):
    return (a + b - 1) // b * b


def _make_arc_margin_kernel(cos_m, sin_m, th, mm, s, easy_margin, tile_n,
                            use_bf16_matmul):
    def kernel(label_ref, x_ref, w_ref, o_ref, wn_ref):
        n_idx = pl.program_id(0)
        b_idx = pl.program_id(1)

        # --- Normalize this weight tile once per N tile, cache in VMEM scratch.
        @pl.when(b_idx == 0)
        def _():
            w = w_ref[...].astype(jnp.float32)                      # [TN, D]
            w_ss = jnp.sum(w * w, axis=-1, keepdims=True)
            wn = w * jax.lax.rsqrt(jnp.maximum(w_ss, 1e-24))
            wn_ref[...] = wn.astype(wn_ref.dtype)

        # --- Normalize the batch tile (cheap, per step).
        x = x_ref[...].astype(jnp.float32)                          # [TB, D]
        x_ss = jnp.sum(x * x, axis=-1, keepdims=True)
        xn = x * jax.lax.rsqrt(jnp.maximum(x_ss, 1e-24))

        wn = wn_ref[...]
        if use_bf16_matmul:
            xn = xn.astype(jnp.bfloat16)                            # wn already bf16

        # cosine[i, j] = <xn[i, :], wn[j, :]>  -- contract last dims, no transpose.
        cosine = jax.lax.dot_general(
            xn, wn,
            dimension_numbers=(((1,), (1,)), ((), ())),
            preferred_element_type=jnp.float32)                     # [TB, TN]

        # Margin math in f32; clamp keeps sqrt real when rounding pushes cos^2 > 1.
        sine = jnp.sqrt(jnp.maximum(1.0 - cosine * cosine, 0.0))
        phi = cosine * cos_m - sine * sin_m
        if easy_margin:
            phi = jnp.where(cosine > 0.0, phi, cosine)
        else:
            phi = jnp.where(cosine > th, phi, cosine - mm)

        # One-hot select via iota compare, offset by this tile's class offset.
        label = label_ref[...]                                      # [TB, 1] int32
        col = jax.lax.broadcasted_iota(jnp.int32, cosine.shape, 1) + n_idx * tile_n
        out = jnp.where(col == label, phi, cosine)
        if s != 1.0:
            out = out * s
        o_ref[...] = out.astype(o_ref.dtype)

    return kernel


@partial(jax.jit,
         static_argnames=("s", "m", "easy_margin", "tile_b", "tile_n",
                          "use_bf16_matmul"))
def arc_margin_product(x, weight, label, *, s=1.0, m=1e-05, easy_margin=False,
                       tile_b=128, tile_n=512, use_bf16_matmul=False):
    """Pallas implementation of ArcMarginProduct.forward.

    x:      [B, in_features] float32
    weight: [out_features, in_features] float32
    label:  [B] integer class ids
    returns [B, out_features] float32
    """
    B, D = x.shape
    N, D2 = weight.shape
    assert D == D2
    assert tile_b % 8 == 0 and tile_n % 128 == 0

    cos_m = math.cos(m)
    sin_m = math.sin(m)
    th = math.cos(math.pi - m)
    mm = math.sin(math.pi - m) * m

    # Tile sizes (clamped for small problems) and padded extents.
    TB = min(tile_b, _round_up(B, 8))
    TN = min(tile_n, _round_up(N, 128))
    Bp = _round_up(B, TB)
    Np = _round_up(N, TN)

    if Bp != B:
        x = jnp.pad(x, ((0, Bp - B), (0, 0)))
        label = jnp.pad(label, (0, Bp - B))
    if Np != N:
        weight = jnp.pad(weight, ((0, Np - N), (0, 0)))

    label2d = label.reshape(Bp, 1).astype(jnp.int32)

    wn_dtype = jnp.bfloat16 if use_bf16_matmul else jnp.float32
    kernel = _make_arc_margin_kernel(cos_m, sin_m, th, mm, s, easy_margin, TN,
                                     use_bf16_matmul)

    # VMEM budget: double-buffered input/output tiles + the wn scratch.
    vmem_est = (2 * TN * D * 4          # weight tiles
                + 2 * TB * D * 4        # x tiles
                + 2 * TB * 1 * 4        # label tiles
                + 2 * TB * TN * 4       # output tiles
                + TN * D * jnp.dtype(wn_dtype).itemsize)
    vmem_limit = int(min(max(2 * vmem_est + (1 << 20), 16 << 20), 48 << 20))

    out = pl.pallas_call(
        kernel,
        out_shape=jax.ShapeDtypeStruct((Bp, Np), jnp.float32),
        grid_spec=pltpu.PrefetchScalarGridSpec(
            num_scalar_prefetch=0,
            grid=(Np // TN, Bp // TB),                  # class axis outer, batch inner
            in_specs=[
                pl.BlockSpec((TB, 1), lambda n, b: (b, 0)),   # label
                pl.BlockSpec((TB, D), lambda n, b: (b, 0)),   # x
                pl.BlockSpec((TN, D), lambda n, b: (n, 0)),   # weight (streamed)
            ],
            out_specs=pl.BlockSpec((TB, TN), lambda n, b: (b, n)),
            scratch_shapes=[pltpu.VMEM((TN, D), wn_dtype)],   # normalized weight tile
        ),
        compiler_params=pltpu.CompilerParams(
            # N tiles are independent (megacore-shardable on v7x); the batch axis
            # carries the wn-scratch reuse dependency -> keep it sequential.
            dimension_semantics=("parallel", "arbitrary"),
            vmem_limit_bytes=vmem_limit,
        ),
    )(label2d, x, weight)

    return out[:B, :N]


def xavier_uniform(key, out_features, in_features):
    # matches torch.nn.init.xavier_uniform_ for a 2-D weight of this shape
    bound = math.sqrt(6.0 / (in_features + out_features))
    return jax.random.uniform(
        key, (out_features, in_features), dtype=jnp.float32,
        minval=-bound, maxval=bound,
    )


def _reference(x, weight, label, *, s, m, easy_margin):
    """Pure-JAX reference mirroring the PyTorch module (plus NaN-safe sqrt)."""
    xn = x / jnp.maximum(jnp.linalg.norm(x, axis=-1, keepdims=True), 1e-12)
    wn = weight / jnp.maximum(jnp.linalg.norm(weight, axis=-1, keepdims=True), 1e-12)
    cosine = xn @ wn.T
    sine = jnp.sqrt(jnp.maximum(1.0 - cosine * cosine, 0.0))
    cos_m, sin_m = math.cos(m), math.sin(m)
    th = math.cos(math.pi - m)
    mm = math.sin(math.pi - m) * m
    phi = cosine * cos_m - sine * sin_m
    if easy_margin:
        phi = jnp.where(cosine > 0.0, phi, cosine)
    else:
        phi = jnp.where(cosine > th, phi, cosine - mm)
    one_hot = jax.nn.one_hot(label, weight.shape[0], dtype=cosine.dtype)
    return (one_hot * phi + (1.0 - one_hot) * cosine) * s


if __name__ == "__main__":
    B = 16            # batch
    IN_FEATURES = 32
    OUT_FEATURES = 384

    key = jax.random.PRNGKey(0)
    kx, kw, kl = jax.random.split(key, 3)

    x = jax.random.normal(kx, (B, IN_FEATURES), dtype=jnp.float32)
    weight = xavier_uniform(kw, OUT_FEATURES, IN_FEATURES)
    label = jax.random.randint(kl, (B,), 0, OUT_FEATURES, dtype=jnp.int32)

    # Small tiles here just to exercise the multi-tile (3 x 2) grid path;
    # production sizes should use the defaults (tile_b=128, tile_n=512+).
    out = arc_margin_product(x, weight, label, s=1.0, m=1e-05,
                             easy_margin=False, tile_b=8, tile_n=128)
    out = jax.block_until_ready(out)

    assert out.shape == (B, OUT_FEATURES)
    assert out.dtype == jnp.float32

    ref = _reference(x, weight, label, s=1.0, m=1e-05, easy_margin=False)
    max_err = float(jnp.max(jnp.abs(out - ref)))
    assert jnp.allclose(out, ref, atol=2e-5, rtol=2e-5), max_err

    print("KERNEL_OK")
</pallas_src>

<mosaic_0001>
module attributes {stable_mosaic.version = 11 : i64} {
  func.func @kernel(%arg0: i32, %arg1: i32, %arg2: memref<8x1xi32, #tpu.memory_space<vmem>>, %arg3: memref<8x32xf32, #tpu.memory_space<vmem>>, %arg4: memref<128x32xf32, #tpu.memory_space<vmem>>, %arg5: memref<8x128xf32, #tpu.memory_space<vmem>>, %arg6: memref<128x32xf32, #tpu.memory_space<vmem>>) attributes {dimension_semantics = [#tpu.dimension_semantics<parallel>, #tpu.dimension_semantics<arbitrary>], iteration_bounds = array<i64: 3, 2>, scalar_prefetch = 0 : i64, scratch_operands = 1 : i64, tpu.core_type = #tpu.core_type<tc>, window_params = [{transform_indices = @transform_0, window_bounds = array<i64: 8, 1>}, {transform_indices = @transform_1, window_bounds = array<i64: 8, 32>}, {transform_indices = @transform_2, window_bounds = array<i64: 128, 32>}, {transform_indices = @transform_3, window_bounds = array<i64: 8, 128>}]} {
    %c0_i32 = arith.constant 0 : i32
    %0 = arith.cmpi eq, %arg1, %c0_i32 : i32
    %1 = arith.extui %0 : i1 to i32
    %c0_i32_0 = arith.constant 0 : i32
    %2 = arith.cmpi ne, %1, %c0_i32_0 : i32
    scf.if %2 {
      %c0_16 = arith.constant 0 : index
      %c0_17 = arith.constant 0 : index
      %39 = vector.load %arg4[%c0_16, %c0_17] : memref<128x32xf32, #tpu.memory_space<vmem>>, vector<128x32xf32>
      %40 = arith.mulf %39, %39 : vector<128x32xf32>
      %cst_18 = arith.constant dense<0.000000e+00> : vector<128xf32>
      %41 = vector.multi_reduction <add>, %40, %cst_18 [1] : vector<128x32xf32> to vector<128xf32>
      %42 = vector.shape_cast %41 : vector<128xf32> to vector<128x1xf32>
      %cst_19 = arith.constant 1.000000e-24 : f32
      %43 = vector.broadcast %cst_19 : f32 to vector<128x1xf32>
      %44 = arith.maximumf %42, %43 : vector<128x1xf32>
      %45 = math.rsqrt %44 : vector<128x1xf32>
      %46 = vector.broadcast %45 : vector<128x1xf32> to vector<128x32xf32>
      %47 = arith.mulf %39, %46 : vector<128x32xf32>
      %c0_20 = arith.constant 0 : index
      %c0_21 = arith.constant 0 : index
      %48 = vector.load %arg6[%c0_20, %c0_21] : memref<128x32xf32, #tpu.memory_space<vmem>>, vector<128x32xf32>
      tpu.vector_store %arg6[%c0_20, %c0_21], %47 {strides = array<i32>} : memref<128x32xf32, #tpu.memory_space<vmem>>, vector<128x32xf32>,
    } else {
    }
    %c0 = arith.constant 0 : index
    %c0_1 = arith.constant 0 : index
    %3 = vector.load %arg3[%c0, %c0_1] : memref<8x32xf32, #tpu.memory_space<vmem>>, vector<8x32xf32>
    %4 = arith.mulf %3, %3 : vector<8x32xf32>
    %cst = arith.constant dense<0.000000e+00> : vector<8xf32>
    %5 = vector.multi_reduction <add>, %4, %cst [1] : vector<8x32xf32> to vector<8xf32>
    %6 = vector.shape_cast %5 : vector<8xf32> to vector<8x1xf32>
    %cst_2 = arith.constant 1.000000e-24 : f32
    %7 = vector.broadcast %cst_2 : f32 to vector<8x1xf32>
    %8 = arith.maximumf %6, %7 : vector<8x1xf32>
    %9 = math.rsqrt %8 : vector<8x1xf32>
    %10 = vector.broadcast %9 : vector<8x1xf32> to vector<8x32xf32>
    %11 = arith.mulf %3, %10 : vector<8x32xf32>
    %c0_3 = arith.constant 0 : index
    %c0_4 = arith.constant 0 : index
    %12 = vector.load %arg6[%c0_3, %c0_4] : memref<128x32xf32, #tpu.memory_space<vmem>>, vector<128x32xf32>
    %cst_5 = arith.constant dense<0.000000e+00> : vector<8x128xf32>
    %13 = tpu.matmul %11, %12, %cst_5 {dimension_numbers = #tpu.dot_dimension_numbers<[1], [1], [0], [0], [0, 0, 1, 0], [], []>} : vector<8x32xf32>, vector<128x32xf32>, vector<8x128xf32> -> vector<8x128xf32>
    %14 = arith.mulf %13, %13 : vector<8x128xf32>
    %cst_6 = arith.constant 1.000000e+00 : f32
    %15 = vector.broadcast %cst_6 : f32 to vector<8x128xf32>
    %16 = arith.subf %15, %14 : vector<8x128xf32>
    %cst_7 = arith.constant 0.000000e+00 : f32
    %17 = vector.broadcast %cst_7 : f32 to vector<8x128xf32>
    %18 = arith.maximumf %16, %17 : vector<8x128xf32>
    %19 = math.sqrt %18 : vector<8x128xf32>
    %cst_8 = arith.constant 1.000000e+00 : f32
    %20 = vector.broadcast %cst_8 : f32 to vector<8x128xf32>
    %21 = arith.mulf %13, %20 : vector<8x128xf32>
    %cst_9 = arith.constant 9.99999974E-6 : f32
    %22 = vector.broadcast %cst_9 : f32 to vector<8x128xf32>
    %23 = arith.mulf %19, %22 : vector<8x128xf32>
    %24 = arith.subf %21, %23 : vector<8x128xf32>
    %cst_10 = arith.constant -1.000000e+00 : f32
    %25 = vector.broadcast %cst_10 : f32 to vector<8x128xf32>
    %26 = arith.cmpf ogt, %13, %25 : vector<8x128xf32>
    %cst_11 = arith.constant 1.000000e-10 : f32
    %27 = vector.broadcast %cst_11 : f32 to vector<8x128xf32>
    %28 = arith.subf %13, %27 : vector<8x128xf32>
    %29 = arith.select %26, %24, %28 : vector<8x128xi1>, vector<8x128xf32>
    %c0_12 = arith.constant 0 : index
    %c0_13 = arith.constant 0 : index
    %30 = vector.load %arg2[%c0_12, %c0_13] : memref<8x1xi32, #tpu.memory_space<vmem>>, vector<8x1xi32>
    %31 = tpu.iota {dimensions = array<i32: 1>} : vector<8x128xi32>
    %c128_i32 = arith.constant 128 : i32
    %32 = arith.muli %arg0, %c128_i32 : i32
    %33 = vector.broadcast %32 : i32 to vector<8x128xi32>
    %34 = arith.addi %31, %33 : vector<8x128xi32>
    %35 = vector.broadcast %30 : vector<8x1xi32> to vector<8x128xi32>
    %36 = arith.cmpi eq, %34, %35 : vector<8x128xi32>
    %37 = arith.select %36, %29, %13 : vector<8x128xi1>, vector<8x128xf32>
    %c0_14 = arith.constant 0 : index
    %c0_15 = arith.constant 0 : index
    %38 = vector.load %arg5[%c0_14, %c0_15] : memref<8x128xf32, #tpu.memory_space<vmem>>, vector<8x128xf32>
    tpu.vector_store %arg5[%c0_14, %c0_15], %37 {strides = array<i32>} : memref<8x128xf32, #tpu.memory_space<vmem>>, vector<8x128xf32>,
    return
  }
  func.func @transform_0(%arg0: i32, %arg1: i32) -> (i32, i32) {
    %c0_i32 = arith.constant 0 : i32
    %c0_i32_0 = arith.constant 0 : i32
    return %arg1, %c0_i32 : i32, i32
  }
  func.func @transform_1(%arg0: i32, %arg1: i32) -> (i32, i32) {
    %c0_i32 = arith.constant 0 : i32
    %c0_i32_0 = arith.constant 0 : i32
    return %arg1, %c0_i32 : i32, i32
  }
  func.func @transform_2(%arg0: i32, %arg1: i32) -> (i32, i32) {
    %c0_i32 = arith.constant 0 : i32
    %c0_i32_0 = arith.constant 0 : i32
    return %arg0, %c0_i32 : i32, i32
  }
  func.func @transform_3(%arg0: i32, %arg1: i32) -> (i32, i32) {
    %c0_i32 = arith.constant 0 : i32
    return %arg1, %arg0 : i32, i32
  }
}

</mosaic_0001>

<bundles_post_ra>
// kernel: arc_margin_product.1
= control target key start
LH: loop header
LB: loop body
LE: loop exit
PB: predicated region body
PF: predicated region fallthrough
CT: control target
= control target key end

     0   :  { %8 = vsyncpa [#allocation4], 0  ;;  %s1276_s0 = inlined_call_operand.vmem [shape: s32[16,1], index: 0, kind: input, shape index: {}]   ;;  %s1277_s1 = inlined_call_operand.vmem [shape: f32[16,32], index: 1, kind: input, shape index: {}]   ;;  %s1278_s2 = inlined_call_operand.vmem [shape: f32[384,32], index: 2, kind: input, shape index: {}]   ;;  %s1279_s3 = inlined_call_operand.hbm [shape: f32[16,384], index: 3, kind: output, shape index: {}]  }
   0x1   :  { %10 = vsyncpa [#allocation4 + $0x1], 0  ;;  %s969_s12 = smov 0   ;;  %s971_s13 = smov 0  }
   0x2   :  { %s973_s14 = smov 0   ;;  %s975_s15 = smov 0  }
   0x3   :  { %s977_s16 = smov 0   ;;  %s979_s17 = smov 0  }
   0x4   :  { %s981_s18 = smov 0   ;;  %s983_s19 = smov 0  }
   0x5 LB: > { %s653_s20 = sadd.s32 4294967295, %s943_s19   ;;  %s654_s21 = sadd.s32 4294967294, %s943_s19   ;;  %s943_s19 = sphi %s983_s19, %s16_s19   ;;  %s939_s18 = sphi %s981_s18, %s1293_s18   ;;  %s935_s17 = sphi %s979_s17, %s1292_s17   ;;  %s931_s16 = sphi %s977_s16, %s1291_s16   ;;  %s927_s15 = sphi %s975_s15, %s1290_s15   ;;  %s923_s14 = sphi %s973_s14, %s1289_s14   ;;  %s919_s13 = sphi %s971_s13, %s1288_s13   ;;  %s915_s12 = sphi %s969_s12, %s1287_s12  }
   0x6   : > { %s25_s22 = sadd.s32 1, %s935_s17  ;;  %s28_s23 = sadd.s32 1, %s939_s18 }
   0x7   : > { %p26_p0 = scmp.ge.s32.totalorder %s25_s22, 2  ;;  %p125_p1 = scmp.ne.s32.totalorder %s923_s14, %s919_s13 }
   0x8   : > { %p126_p2 = scmp.eq.s32.totalorder %s653_s20, 5  ;;  %p131_p5 = scmp.ne.s32.totalorder %s919_s13, %s915_s12 }
   0x9   : > { %s1295_s22 = smov (%p26_p0, %s25_s22), 0  ;;  %s1297_s23 = smov (!%p26_p0, %s28_s23), %s939_s18 }
   0xa   : > { %s110_s24 = ssub.s32 %s935_s17, %s1295_s22  ;;  %p1020_p3 = por %p126_p2, %p125_p1 }
   0xb   : > { %p30_p4 = scmp.ge.s32.totalorder %s1297_s23, 3  ;;  %p132_p6 = scmp.eq.s32.totalorder %s654_s21, 5 }
   0xc   : > { %p657_p7 = scmp.ge.s32.totalorder %s943_s19, 1  ;;  %p173_p9 = scmp.lt.s32.totalorder %s943_s19, 7 }
   0xd   : > { %s1299_s23 = smov (%p30_p4, %s1297_s23), 0  ;;  %p1029_p8 = por %p132_p6, %p131_p5 }
   0xe   : > { %1283 = sst [smem:[#allocation6_spill]] %s1299_s23  ;;  %s111_s27 = ssub.s32 %s939_s18, %s1299_s23 }
   0xf   : > { %s115_s28 = sadd.s32 1, %s923_s14  ;;  %s112_s29 = sor.u32 %s111_s27, %s110_s24 }
  0x10   : > { %p174_p10 = pnand %p657_p7, %p173_p9  ;;  %p113_p11 = scmp.eq.s32.totalorder %s112_s29, 0 }
  0x11   : > { %s1280_s4 = sand.u32 (!%p174_p10), 1, %s919_s13   ;;  %p205_p12 = scmp.lt.s32.totalorder (!%p174_p10), %s927_s15, 1 }
  0x12   : > { %s1038_s30 = scalar_select %p113_p11, %s923_s14, %s115_s28  }
  0x13   : > { %177 = sbr.rel (%p174_p10) target bundleno = 616 (0x268), region = 32  ;;  %s1044_s5 = sshll.u32 (!%p174_p10), %s1280_s4, 3 }
  0x14   : > { %s661_s6 = sshll.u32 (!%p174_p10), %s931_s16, 4  ;;  %s204_s23 = scalar_lea.vmem (!%p174_p10), [#allocation3], %s1044_s5 }
  0x15   : > { %p214_p13 = scmp.lt.s32.totalorder (!%p174_p10), %s661_s6, 47  ;;  %p663_p0 = scmp.ne.s32.totalorder (!%p174_p10), %s927_s15, 0 }
  0x18   : > { %s206_s7 = scalar_select %p205_p12, %s927_s15, 1 }
  0x19   : > { %s1301_s6 = smov (!%p214_p13, %s661_s6), 47  ;;  %222 = sbr.rel (%p663_p0) target bundleno = 220 (0xdc), region = 36 }
  0x1a   : > { %s659_s8 = sshll.u32 %s206_s7, 3  ;;  %s662_s27 = sshll.u32 %s1301_s6, 3 }
  0x1b   : > { %s1051_s11 = scalar_lea.vmem %s1276_s0, %s659_s8  ;;  %s1056_s24 = scalar_lea.vmem %s1277_s1, %s659_s8 }
  0x1c   : > { %s1061_s4 = scalar_lea.vmem %s1278_s2, %s662_s27 }
  0x1e   : > { %v1066_v0 = vld [vmem:[%s1061_s4 + $0x10] sm:$0xff]  ;;  %vm255_vm0 = vcmask 261120   ;;  %v1069_v1 = vld [vmem:[%s1061_s4] sm:$0xff]  ;;  %v1072_v2 = vld [vmem:[%s1061_s4 + $0x18] sm:$0xff] }
  0x1f   : > { %v241_v3 = vmul.f32 %v1066_v0, %v1066_v0  ;;  %v239_v4 = vmul.f32 %v1069_v1, %v1069_v1  ;;  %v242_v5 = vmul.f32 %v1072_v2, %v1072_v2  ;;  %v1081_v6 = vld [vmem:[%s1061_s4 + $0x8] sm:$0xff]  ;;  %v1089_v9 = vld [vmem:[%s1061_s4 + $0x20] sm:$0xff]  ;;  %v1100_v16 = vld [vmem:[%s1061_s4 + $0x38] sm:$0xff] }
  0x20   : > { %v240_v7 = vmul.f32 %v1081_v6, %v1081_v6  ;;  %v1086_v8 = vld [vmem:[%s1061_s4 + $0x28] sm:$0xff]  ;;  %v243_v15 = vmul.f32 %v1089_v9, %v1089_v9  ;;  %v1103_v17 = vld [vmem:[%s1061_s4 + $0x30] sm:$0xff]  ;;  %v246_v20 = vmul.f32 %v1100_v16, %v1100_v16  ;;  %v1115_v23 = vld [vmem:[%s1061_s4 + $0x40] sm:$0xff] }
  0x21   : > { %v262_v10 = vsel %vm255_vm0, %v241_v3, 0.0  ;;  %v256_v11 = vsel %vm255_vm0, %v239_v4, 0.0  ;;  %v265_v12 = vsel %vm255_vm0, %v242_v5, 0.0  ;;  %v244_v14 = vmul.f32 %v1086_v8, %v1086_v8  ;;  %v1112_v22 = vld [vmem:[%s1061_s4 + $0x48] sm:$0xff]  ;;  %v1124_v28 = vld [vmem:[%s1061_s4 + $0x58] sm:$0xff]  ;;  %v1127_v29 = vld [vmem:[%s1061_s4 + $0x50] sm:$0xff] }
  0x22   : > { %263 = vadd.xlane.f32.xlu1 %v262_v10  ;;  %257 = vadd.xlane.f32.xlu0 %v256_v11  ;;  %v259_v13 = vsel %vm255_vm0, %v240_v7, 0.0  ;;  %v268_v19 = vsel %vm255_vm0, %v243_v15, 0.0  ;;  %v245_v21 = vmul.f32 %v1103_v17, %v1103_v17  ;;  %v277_v24 = vsel %vm255_vm0, %v246_v20, 0.0  ;;  %v1136_v34 = vld [vmem:[%s1061_s4 + $0x68] sm:$0xff]  ;;  %v1139_v35 = vld [vmem:[%s1061_s4 + $0x60] sm:$0xff]  ;;  %v1148_v40 = vld [vmem:[%s1061_s4 + $0x78] sm:$0xff] }
  0x23   : > { %v271_v18 = vsel %vm255_vm0, %v244_v14, 0.0  ;;  %v248_v26 = vmul.f32 %v1112_v22, %v1112_v22  ;;  %v247_v27 = vmul.f32 %v1115_v23, %v1115_v23  ;;  %v250_v32 = vmul.f32 %v1124_v28, %v1124_v28  ;;  %v1151_v41 = vld [vmem:[%s1061_s4 + $0x70] sm:$0xff] }
  0x24   : > { %v274_v25 = vsel %vm255_vm0, %v245_v21, 0.0  ;;  %v249_v33 = vmul.f32 %v1127_v29, %v1127_v29  ;;  %v252_v38 = vmul.f32 %v1136_v34, %v1136_v34  ;;  %v251_v39 = vmul.f32 %v1139_v35, %v1139_v35 }
  0x25   : > { %v283_v30 = vsel %vm255_vm0, %v248_v26, 0.0  ;;  %v280_v31 = vsel %vm255_vm0, %v247_v27, 0.0  ;;  %v289_v36 = vsel %vm255_vm0, %v250_v32, 0.0  ;;  %v254_v44 = vmul.f32 %v1148_v40, %v1148_v40 }
  0x26   : > { %266 = vadd.xlane.f32.xlu1 %v265_v12  ;;  %260 = vadd.xlane.f32.xlu0 %v259_v13  ;;  %v286_v37 = vsel %vm255_vm0, %v249_v33, 0.0  ;;  %v295_v42 = vsel %vm255_vm0, %v252_v38, 0.0  ;;  %v292_v43 = vsel %vm255_vm0, %v251_v39, 0.0  ;;  %v253_v45 = vmul.f32 %v1151_v41, %v1151_v41 }
  0x27   : > { %v301_v46 = vsel %vm255_vm0, %v254_v44, 0.0 }
  0x28   : > { %v298_v47 = vsel %vm255_vm0, %v253_v45, 0.0 }
  0x2a   : > { %272 = vadd.xlane.f32.xlu1 %v271_v18  ;;  %269 = vadd.xlane.f32.xlu0 %v268_v19 }
  0x2e   : > { %278 = vadd.xlane.f32.xlu1 %v277_v24  ;;  %275 = vadd.xlane.f32.xlu0 %v274_v25 }
  0x32   : > { %284 = vadd.xlane.f32.xlu1 %v283_v30  ;;  %281 = vadd.xlane.f32.xlu0 %v280_v31 }
  0x36   : > { %290 = vadd.xlane.f32.xlu1 %v289_v36  ;;  %287 = vadd.xlane.f32.xlu0 %v286_v37 }
  0x3a   : > { %296 = vadd.xlane.f32.xlu1 %v295_v42  ;;  %293 = vadd.xlane.f32.xlu0 %v292_v43 }
  0x3e   : > { %302 = vadd.xlane.f32.xlu1 %v301_v46  ;;  %299 = vadd.xlane.f32.xlu0 %v298_v47 }
  0xab   : > { %v264_v48 = vpop.xlane.xlu1 %263  ;;  %v258_v49 = vpop.xlane.xlu0 %257 }
  0xac   : > { %v306_v50 = vmax.f32 %v264_v48, 1e-24  ;;  %v304_v51 = vmax.f32 %v258_v49, 1e-24 }
  0xae   : > { %814 = vrsqrt.f32 %v306_v50 }
  0xaf   : > { %816 = vrsqrt.f32 %v304_v51  ;;  %v267_v52 = vpop.xlane.xlu1 %266  ;;  %v261_v53 = vpop.xlane.xlu0 %260 }
  0xb0   : > { %v307_v54 = vmax.f32 %v267_v52, 1e-24  ;;  %v305_v55 = vmax.f32 %v261_v53, 1e-24 }
  0xb2   : > { %818 = vrsqrt.f32 %v307_v54 }
  0xb3   : > { %820 = vrsqrt.f32 %v305_v55  ;;  %v273_v56 = vpop.xlane.xlu1 %272  ;;  %v270_v57 = vpop.xlane.xlu0 %269 }
  0xb4   : > { %v309_v58 = vmax.f32 %v273_v56, 1e-24  ;;  %v308_v59 = vmax.f32 %v270_v57, 1e-24 }
  0xb6   : > { %822 = vrsqrt.f32 %v309_v58 }
  0xb7   : > { %824 = vrsqrt.f32 %v308_v59  ;;  %v279_v60 = vpop.xlane.xlu1 %278  ;;  %v276_v61 = vpop.xlane.xlu0 %275 }
  0xb8   : > { %v311_v62 = vmax.f32 %v279_v60, 1e-24  ;;  %v310_v63 = vmax.f32 %v276_v61, 1e-24 }
  0xba   : > { %826 = vrsqrt.f32 %v311_v62 }
  0xbb   : > { %v815_v3 = vpop.eup %814  ;;  %828 = vrsqrt.f32 %v310_v63  ;;  %v285_v4 = vpop.xlane.xlu1 %284 }
  0xbc   : > { %v282_v5 = vpop.xlane.xlu0 %281  ;;  %v817_v7 = vpop.eup %816  ;;  %v338_v10 = vmul.f32 %v815_v3, %v1066_v0  ;;  %v313_v11 = vmax.f32 %v285_v4, 1e-24 }
  0xbd   : > { %v312_v12 = vmax.f32 %v282_v5, 1e-24  ;;  %v336_v13 = vmul.f32 %v817_v7, %v1069_v1 }
  0xbe   : > { %354 = vst.msk [vmem:[#allocation2 + $0x10] sm:$0xff] %vm255_vm0, %v338_v10  ;;  %830 = vrsqrt.f32 %v313_v11 }
  0xbf   : > { %v819_v14 = vpop.eup %818  ;;  %352 = vst.msk [vmem:[#allocation2] sm:$0xff] %vm255_vm0, %v336_v13  ;;  %832 = vrsqrt.f32 %v312_v12  ;;  %v291_v15 = vpop.xlane.xlu1 %290 }
  0xc0   : > { %v288_v18 = vpop.xlane.xlu0 %287  ;;  %v821_v19 = vpop.eup %820  ;;  %v339_v20 = vmul.f32 %v819_v14, %v1072_v2  ;;  %v315_v21 = vmax.f32 %v291_v15, 1e-24 }
  0xc1   : > { %v314_v24 = vmax.f32 %v288_v18, 1e-24  ;;  %v337_v0 = vmul.f32 %v821_v19, %v1081_v6 }
  0xc2   : > { %355 = vst.msk [vmem:[#allocation2 + $0x18] sm:$0xff] %vm255_vm0, %v339_v20  ;;  %834 = vrsqrt.f32 %v315_v21 }
  0xc3   : > { %v823_v1 = vpop.eup %822  ;;  %353 = vst.msk [vmem:[#allocation2 + $0x8] sm:$0xff] %vm255_vm0, %v337_v0  ;;  %836 = vrsqrt.f32 %v314_v24  ;;  %v297_v25 = vpop.xlane.xlu1 %296 }
  0xc4   : > { %v294_v26 = vpop.xlane.xlu0 %293  ;;  %v825_v27 = vpop.eup %824  ;;  %v341_v30 = vmul.f32 %v823_v1, %v1086_v8  ;;  %v317_v31 = vmax.f32 %v297_v25, 1e-24 }
  0xc5   : > { %v316_v32 = vmax.f32 %v294_v26, 1e-24  ;;  %v340_v2 = vmul.f32 %v825_v27, %v1089_v9 }
  0xc6   : > { %357 = vst.msk [vmem:[#allocation2 + $0x28] sm:$0xff] %vm255_vm0, %v341_v30  ;;  %838 = vrsqrt.f32 %v317_v31 }
  0xc7   : > { %v827_v6 = vpop.eup %826  ;;  %356 = vst.msk [vmem:[#allocation2 + $0x20] sm:$0xff] %vm255_vm0, %v340_v2  ;;  %840 = vrsqrt.f32 %v316_v32  ;;  %v303_v33 = vpop.xlane.xlu1 %302 }
  0xc8   : > { %v300_v36 = vpop.xlane.xlu0 %299  ;;  %v829_v37 = vpop.eup %828  ;;  %v343_v38 = vmul.f32 %v827_v6, %v1100_v16  ;;  %v319_v39 = vmax.f32 %v303_v33, 1e-24 }
  0xc9   : > { %v318_v42 = vmax.f32 %v300_v36, 1e-24  ;;  %v342_v8 = vmul.f32 %v829_v37, %v1103_v17 }
  0xca   : > { %359 = vst.msk [vmem:[#allocation2 + $0x38] sm:$0xff] %vm255_vm0, %v343_v38  ;;  %842 = vrsqrt.f32 %v319_v39 }
  0xcb   : > { %v831_v9 = vpop.eup %830  ;;  %358 = vst.msk [vmem:[#allocation2 + $0x30] sm:$0xff] %vm255_vm0, %v342_v8  ;;  %844 = vrsqrt.f32 %v318_v42 }
  0xcc   : > { %v833_v43 = vpop.eup %832  ;;  %v345_v44 = vmul.f32 %v831_v9, %v1112_v22 }
  0xcd   : > { %v344_v45 = vmul.f32 %v833_v43, %v1115_v23 }
  0xce   : > { %361 = vst.msk [vmem:[#allocation2 + $0x48] sm:$0xff] %vm255_vm0, %v345_v44 }
  0xcf   : > { %v835_v46 = vpop.eup %834  ;;  %360 = vst.msk [vmem:[#allocation2 + $0x40] sm:$0xff] %vm255_vm0, %v344_v45 }
  0xd0   : > { %v837_v16 = vpop.eup %836  ;;  %v347_v17 = vmul.f32 %v835_v46, %v1124_v28 }
  0xd1   : > { %v346_v47 = vmul.f32 %v837_v16, %v1127_v29 }
  0xd2   : > { %363 = vst.msk [vmem:[#allocation2 + $0x58] sm:$0xff] %vm255_vm0, %v347_v17 }
  0xd3   : > { %v839_v48 = vpop.eup %838  ;;  %362 = vst.msk [vmem:[#allocation2 + $0x50] sm:$0xff] %vm255_vm0, %v346_v47 }
  0xd4   : > { %v841_v49 = vpop.eup %840  ;;  %v349_v22 = vmul.f32 %v839_v48, %v1136_v34 }
  0xd5   : > { %v348_v23 = vmul.f32 %v841_v49, %v1139_v35 }
  0xd6   : > { %365 = vst.msk [vmem:[#allocation2 + $0x68] sm:$0xff] %vm255_vm0, %v349_v22 }
  0xd7   : > { %v843_v50 = vpop.eup %842  ;;  %364 = vst.msk [vmem:[#allocation2 + $0x60] sm:$0xff] %vm255_vm0, %v348_v23 }
  0xd8   : > { %v845_v51 = vpop.eup %844  ;;  %v351_v28 = vmul.f32 %v843_v50, %v1148_v40 }
  0xd9   : > { %v350_v29 = vmul.f32 %v845_v51, %v1151_v41 }
  0xda   : > { %367 = vst.msk [vmem:[#allocation2 + $0x78] sm:$0xff] %vm255_vm0, %v351_v28 }
  0xdb   : > { %366 = vst.msk [vmem:[#allocation2 + $0x70] sm:$0xff] %vm255_vm0, %v350_v29 }
  0xdc PF: > { %v1194_v52 = vld [vmem:[%s1056_s24] sm:$0xff]  ;;  %vm370_vm1 = vcmask 261120   ;;  %v945_v53 = vmov 0.0   ;;  %v388_v56 = vld [vmem:[#allocation2 + $0x58] sm:$0xff]  ;;  %vm946_vm2 = vmmov 0   ;;  %v387_v57 = vld [vmem:[#allocation2 + $0x50] sm:$0xff]  ;;  %v530_v0 = vlaneseq }
  0xdd   : > { %v369_v35 = vmul.f32 %v1194_v52, %v1194_v52  ;;  %704 = vmatprep.subr.mxu0 %v945_v53  ;;  %v390_v54 = vld [vmem:[#allocation2 + $0x68] sm:$0xff]  ;;  %736 = vmatprep.mubr.msk.f32.mxu0 %vm946_vm2, %v945_v53  ;;  %v385_v59 = vld [vmem:[#allocation2 + $0x40] sm:$0xff]  ;;  %v384_v60 = vld [vmem:[#allocation2 + $0x38] sm:$0xff]  ;;  %v947_v62 = vmov 0   ;;  %s682_s4 = sshll.u32 %s931_s16, 7  ;;  %s739_s6 = smul.u32 3, %s927_s15 }
  0xde   : > { %v389_v55 = vld [vmem:[#allocation2 + $0x60] sm:$0xff]  ;;  %v386_v58 = vld [vmem:[#allocation2 + $0x48] sm:$0xff]  ;;  %846 = vset.pattern.permute.xlu0 %v947_v62  ;;  %v383_v63 = vld [vmem:[#allocation2 + $0x30] sm:$0xff]  ;;  %v531_v1 = vand.u32 127, %v530_v0  ;;  %v533_v26 = vstv %s682_s4  ;;  %s557_s9 = sshll.u32 %s204_s23, 4  ;;  %s948_s24 = smov [#allocation3]   ;;  %s558_s9 = int_to_ptr.vmem [resolvable:$true] %s557_s9 }
  0xdf   : > { %v371_v40 = vsel %vm370_vm1, %v369_v35, 0.0  ;;  %v529_v61 = vld [vmem:[%s1051_s11] sm:$0xff]  ;;  %v382_v3 = vld [vmem:[#allocation2 + $0x28] sm:$0xff]  ;;  %v380_v5 = vld [vmem:[#allocation2 + $0x18] sm:$0xff]  ;;  %s553_s7 = sadd.s32 %s931_s16, %s739_s6  ;;  %s1285_s16 = sand.u32 1, %s919_s13  }
  0xe0   : > { %372 = vadd.xlane.f32.xlu0 %v371_v40  ;;  %v381_v4 = vld [vmem:[#allocation2 + $0x20] sm:$0xff]  ;;  %v379_v7 = vld [vmem:[#allocation2 + $0x10] sm:$0xff]  ;;  %v378_v10 = vld [vmem:[#allocation2 + $0x8] sm:$0xff]  ;;  %v534_v32 = vadd.s32 %v533_v26, %v531_v1  ;;  %s684_s8 = sshll.u32 %s553_s7, 7  ;;  %s542_s20 = scalar_lea.sflag [#allocation4], %s1285_s16 }
  0xe1   : > { %v392_v34 = vld [vmem:[#allocation2 + $0x78] sm:$0xff]  ;;  %v377_v11 = vld [vmem:[#allocation2] sm:$0xff]  ;;  %s1226_s11 = scalar_lea.hbm %s1279_s3, %s684_s8  ;;  %s851_s21 = scalar_lea.vmem %s558_s9, 128 }
  0xe2   : > { %705 = vmatpush3.xpose.msk.msra.mxu0 %vm370_vm1, %v392_v34  ;;  %v391_v41 = vld [vmem:[#allocation2 + $0x70] sm:$0xff]  ;;  %p852_p1 = scmp.ne.s32.totalorder %s558_s9, %s851_s21  ;;  %s855_s27 = sshll.u32 %s948_s24, 4  ;;  %s856_s27 = int_to_ptr.vmem [resolvable:$false] %s855_s27 }
  0xe3   : > { %706 = vmatprep.subr.mxu0 %v945_v53  ;;  %s857_s28 = scalar_lea.vmem %s856_s27, 256  ;;  %p858_p5 = scmp.lt.s32.totalorder %s558_s9, %s856_s27 }
  0xe4   : > { %p853_p2 = pnand %p852_p1, %p1020_p3  ;;  %p859_p6 = scmp.lt.s32.totalorder %s857_s28, %s851_s21 }
  0xe6   : > { %707 = vmatpush3.xpose.msk.msra.mxu0 %vm370_vm1, %v391_v41  ;;  %p854_p4 = pneg %p853_p2  ;;  %p860_p7 = por %p859_p6, %p858_p5 }
  0xe7   : > { %708 = vmatprep.subr.mxu0 %v945_v53 }
  0xe8   : > { %p861_p9 = pnand %p860_p7, %p854_p4 }
  0xea   : > { %709 = vmatpush3.xpose.msk.msra.mxu0 %vm370_vm1, %v390_v54 }
  0xeb   : > { %710 = vmatprep.subr.mxu0 %v945_v53 }
  0xee   : > { %711 = vmatpush3.xpose.msk.msra.mxu0 %vm370_vm1, %v389_v55 }
  0xef   : > { %712 = vmatprep.subr.mxu0 %v945_v53 }
  0xf2   : > { %713 = vmatpush3.xpose.msk.msra.mxu0 %vm370_vm1, %v388_v56 }
  0xf3   : > { %714 = vmatprep.subr.mxu0 %v945_v53 }
  0xf6   : > { %715 = vmatpush3.xpose.msk.msra.mxu0 %vm370_vm1, %v387_v57  ;;  %536 = vperm.xlu0 %846, %v529_v61  }
  0xf7   : > { %716 = vmatprep.subr.mxu0 %v945_v53 }
  0xfa   : > { %717 = vmatpush3.xpose.msk.msra.mxu0 %vm370_vm1, %v386_v58 }
  0xfb   : > { %718 = vmatprep.subr.mxu0 %v945_v53 }
  0xfe   : > { %719 = vmatpush3.xpose.msk.msra.mxu0 %vm370_vm1, %v385_v59 }
  0xff   : > { %720 = vmatprep.subr.mxu0 %v945_v53 }
 0x102   : > { %721 = vmatpush3.xpose.msk.msra.mxu0 %vm370_vm1, %v384_v60 }
 0x103   : > { %722 = vmatprep.subr.mxu0 %v945_v53 }
 0x106   : > { %723 = vmatpush3.xpose.msk.msra.mxu0 %vm370_vm1, %v383_v63 }
 0x107   : > { %724 = vmatprep.subr.mxu0 %v945_v53 }
 0x10a   : > { %725 = vmatpush3.xpose.msk.msra.mxu0 %vm370_vm1, %v382_v3 }
 0x10b   : > { %726 = vmatprep.subr.mxu0 %v945_v53 }
 0x10e   : > { %727 = vmatpush3.xpose.msk.msra.mxu0 %vm370_vm1, %v381_v4 }
 0x10f   : > { %728 = vmatprep.subr.mxu0 %v945_v53 }
 0x112   : > { %729 = vmatpush3.xpose.msk.msra.mxu0 %vm370_vm1, %v380_v5 }
 0x113   : > { %730 = vmatprep.subr.mxu0 %v945_v53 }
 0x116   : > { %731 = vmatpush3.xpose.msk.msra.mxu0 %vm370_vm1, %v379_v7 }
 0x117   : > { %732 = vmatprep.subr.mxu0 %v945_v53 }
 0x11a   : > { %733 = vmatpush3.xpose.msk.msra.mxu0 %vm370_vm1, %v378_v10 }
 0x11b   : > { %734 = vmatprep.subr.mxu0 %v945_v53 }
 0x11e   : > { %735 = vmatpush3.xpose.msk.msra.mxu0 %vm370_vm1, %v377_v11 }
 0x169   : > { %v373_v12 = vpop.xlane.xlu0 %372 }
 0x16a   : > { %v374_v13 = vmax.f32 %v373_v12, 1e-24 }
 0x16c   : > { %847 = vrsqrt.f32 %v374_v13 }
 0x171   : > { %v537_v6 = vpop.permute.xlu0 %536 }
 0x172   : > { %vm538_vm5 = vcmp.eq.s32.totalorder %v534_v32, %v537_v6 }
 0x179   : > { %v848_v14 = vpop.eup %847 }
 0x17a   : > { %v376_v15 = vmul.f32 %v848_v14, %v1194_v52 }
 0x17c   : > { %737 = vmatmul.mubr.msk.f32.vlgmr.msra.gmra.mxu0 %vm370_vm1, %v376_v15 }
 0x23c   : > { %v510_v18 = vpop.f32.mrf.mxu0 }
 0x23d   : > { %v514_v19 = vmul.f32 %v510_v18, %v510_v18  ;;  %v681_v37 = vadd.f32 -1e-10, %v510_v18  ;;  %vm526_vm6 = vcmp.gt.f32.partialorder %v510_v18, -1.0 }
 0x23e   : > { %v738_v20 = vpop.f32.mrf.mxu0 }
 0x23f   : > { %v515_v21 = vsub.f32 1.0, %v514_v19 }
 0x241   : > { %v516_v24 = vmax.f32 %v515_v21, 0.0 }
 0x243   : > { %849 = vrsqrt.f32 %v516_v24  ;;  %vm519_vm3 = vcmp.eq.f32.partialorder %v516_v24, inf  ;;  %v522_v30 = vand.u32 2147483648, %v516_v24  ;;  %vm521_vm4 = vcmp.eq.f32.partialorder %v516_v24, 0.0 }
 0x250   : > { %v850_v25 = vpop.eup %849 }
 0x251   : > { %v518_v27 = vmul.f32 %v850_v25, %v516_v24 }
 0x253   : > { %v520_v31 = vsel %vm519_vm3, %v516_v24, %v518_v27 }
 0x254   : > { %v523_v2 = vsel %vm521_vm4, %v522_v30, %v520_v31 }
 0x255   : > { %v524_v33 = vmul.f32 1e-05, %v523_v2 }
 0x257   : > { %v525_v36 = vsub.f32 %v510_v18, %v524_v33 }
 0x259   : > { %v528_v38 = vsel %vm526_vm6, %v525_v36, %v681_v37 }
 0x25a   : > { %v539_v39 = vsel %vm538_vm5, %v528_v38, %v510_v18 }
 0x25b   : > { %540 = vst [vmem:[%s204_s23] sm:$0xff] %v539_v39 }
 0x25c   : > { %864 = shalt.err (!%p861_p9)
}
 0x25d   : > { %s865_s23 = scalar_lea.hbm %s1226_s11, 128  ;;  %s869_s4 = scalar_lea.hbm %s1279_s3, 768 }
 0x25e   : > { %p866_p10 = scmp.ne.s32.totalorder %s1226_s11, %s865_s23  ;;  %p870_p13 = scmp.lt.s32.totalorder %s1226_s11, %s1279_s3 }
 0x25f   : > { %p871_p0 = scmp.lt.s32.totalorder %s869_s4, %s865_s23 }
 0x260   : > { %p867_p11 = pnand %p866_p10, %p1020_p3 }
 0x261   : > { %p872_p1 = por %p871_p0, %p870_p13 }
 0x262   : > { %p868_p12 = pneg %p867_p11 }
 0x264   : > { %p873_p2 = pnand %p872_p1, %p868_p12 }
 0x266   : > { %876 = shalt.err (!%p873_p2)
}
 0x267   : > { %740 = dma.vmem_to_hbm [thread:$0]  (%p1020_p3), %s558_s9, 128, %s1226_s11, %s542_s20  }
 0x268 PF: > { %p746_p4 = scmp.ge.s32.totalorder %s943_s19, 2  ;;  %s569_s8 = sand.u32 1, %s915_s12  }
 0x269   : > { %s570_s15 = scalar_lea.sflag [#allocation4], %s569_s8 }
 0x26a   : > { %p743_p5 = pnand %p746_p4, %p1029_p8 }
 0x26c   : > { %p744_p6 = pneg %p743_p5 }
 0x26e   : > { %910 = dma.done.wait (%p744_p6), %s570_s15, 128  }
 0x26f   : > { %912 = vsyncadd (%p744_p6), %s570_s15, 4294967168  ;;  %s16_s19 = sadd.s32 1, %s943_s19   ;;  %s1286_s25 = sld [smem:[#allocation6_spill]] }
 0x270   : > { %p13_p7 = scmp.ge.s32.totalorder %s16_s19, 8   ;;  %s1287_s12 = smov %s919_s13 }
 0x271   : > { %s1288_s13 = smov %s923_s14  ;;  %s1289_s14 = smov %s1038_s30 }
 0x272   : > { %s1290_s15 = smov %s935_s17  ;;  %s1291_s16 = smov %s939_s18 }
 0x273   : > { %s1292_s17 = smov %s1295_s22  ;;  %15 = sbr.rel (!%p13_p7) target bundleno = 5 (0x5), region = 77 }
 0x275   : > { %s1293_s18 = smov %s1286_s25 }
 0x278   :  { %575 = vsyncpa [#allocation4], 1 }
 0x279   :  { %577 = vsyncpa [#allocation4 + $0x1], 1 }

</bundles_post_ra>
